<compile_context>
chip_gen: v6e
topology: v6e:2x2x1
jax: 0.10.0
libtpu: 0.0.40
codegen_flags: <defaults>
</compile_context>

<pallas_src>
import functools

import jax
import jax.numpy as jnp
from jax.experimental import pallas as pl
from jax.experimental.pallas import tpu as pltpu


def _round_up(x, m):
    return ((x + m - 1) // m) * m


def critic_kernel(st_ref, w0_ref, b0_ref, w1_ref, b1_ref, w2_ref, b2_ref, out_ref):
    # st_ref: (num_states, TB) tile of s^T -- batch along the lane axis.
    st = st_ref[...]
    # Layer 0: (64, num_states) @ (num_states, TB) -> (64, TB), bias column, tanh.
    h = jnp.dot(w0_ref[...], st, preferred_element_type=jnp.float32) + b0_ref[...]
    h = jnp.tanh(h)
    # Layer 1: (64, 64) @ (64, TB) -> (64, TB), bias column, tanh.
    h = jnp.dot(w1_ref[...], h, preferred_element_type=jnp.float32) + b1_ref[...]
    h = jnp.tanh(h)
    # Value head (64 -> 1): VPU multiply + sublane reduction (no MXU pass needed).
    # Result (1, TB) is already lane-major -> unmasked lane-dense store.
    v = jnp.sum(h * w2_ref[...], axis=0, keepdims=True) + b2_ref[...]
    out_ref[...] = v.astype(out_ref.dtype)


@functools.partial(jax.jit, static_argnames=("block_batch",))
def critic_forward(s, w0, b0, w1, b1, w2, b2, *, block_batch=512):
    """Critic value head.

    s:  (batch, num_states) f32
    w0: (64, num_states), b0: (64,)   -- PyTorch nn.Linear (out, in) layout
    w1: (64, 64),         b1: (64,)
    w2: (1, 64),          b2: (1,)
    returns: (batch, 1) f32
    """
    batch, num_states = s.shape
    h0 = w0.shape[0]
    h1 = w1.shape[0]

    # Batch tile: multiple of 128 lanes; pad batch up to a multiple of it.
    tb = min(_round_up(block_batch, 128), _round_up(batch, 128))
    b_pad = _round_up(batch, tb)
    n_tiles = b_pad // tb

    # Wrapper-side layout plumbing: present the batch on the lane axis.
    st = jnp.pad(s, ((0, b_pad - batch), (0, 0))).T          # (num_states, b_pad)

    b0c = b0.reshape(h0, 1)
    b1c = b1.reshape(h1, 1)
    w2c = w2.reshape(h1, 1)                                   # (64, 1) column
    b2c = b2.reshape(1, 1)

    const = lambda shape: pl.BlockSpec(shape, lambda i, _s=shape: (0,) * len(_s))

    out = pl.pallas_call(
        critic_kernel,
        out_shape=jax.ShapeDtypeStruct((1, b_pad), jnp.float32),
        grid=(n_tiles,),
        in_specs=[
            pl.BlockSpec((num_states, tb), lambda i: (0, i)),  # streamed s^T tiles
            const(w0.shape), const(b0c.shape),                 # resident params
            const(w1.shape), const(b1c.shape),
            const(w2c.shape), const(b2c.shape),
        ],
        out_specs=pl.BlockSpec((1, tb), lambda i: (0, i)),     # lane-dense output
        compiler_params=pltpu.CompilerParams(
            dimension_semantics=("parallel",),
        ),
    )(st, w0, b0c, w1, b1c, w2c, b2c)

    return out[0, :batch].reshape(batch, 1)


# ---------------- deterministic parameter construction (host side) ----------------

def orthogonal_weight(key, out_features, in_features, gain=1.0):
    """Mimics torch.nn.init.orthogonal_ on a (out, in) weight."""
    rows, cols = out_features, in_features
    transposed = rows < cols
    a = jax.random.normal(key, (max(rows, cols), min(rows, cols)), dtype=jnp.float32)
    q, r = jnp.linalg.qr(a)
    d = jnp.sign(jnp.diagonal(r))        # sign correction (matches torch semantics)
    q = q * d[None, :]
    w = q.T if transposed else q         # (out, in)
    return (gain * w).astype(jnp.float32)


def default_linear_params(key, out_features, in_features):
    """PyTorch default nn.Linear init: U(-1/sqrt(in), 1/sqrt(in)) for W and b."""
    kw, kb = jax.random.split(key)
    bound = 1.0 / jnp.sqrt(jnp.float32(in_features))
    w = jax.random.uniform(kw, (out_features, in_features), jnp.float32, -bound, bound)
    b = jax.random.uniform(kb, (out_features,), jnp.float32, -bound, bound)
    return w, b


if __name__ == "__main__":
    # Small shapes consistent with the module: num_states=16, hidden=[64, 64], out=1
    batch = 8
    num_states = 16
    hdim = 64

    root = jax.random.PRNGKey(0)
    k_s, k_w0, k_w1, k_l2 = jax.random.split(root, 4)

    s = jax.random.normal(k_s, (batch, num_states), dtype=jnp.float32)

    # Hidden layers: orthogonal weights (gain=1), zero bias.
    w0 = orthogonal_weight(k_w0, hdim, num_states)     # (64, 16)
    b0 = jnp.zeros((hdim,), jnp.float32)
    w1 = orthogonal_weight(k_w1, hdim, hdim)           # (64, 64)
    b1 = jnp.zeros((hdim,), jnp.float32)
    # Final value head keeps PyTorch's default Linear init.
    w2, b2 = default_linear_params(k_l2, 1, hdim)      # (1, 64), (1,)

    v = critic_forward(s, w0, b0, w1, b1, w2, b2)
    v = jax.block_until_ready(v)

    # Pure-JAX reference (same math, PyTorch layout).
    ref = jnp.tanh(s @ w0.T + b0)
    ref = jnp.tanh(ref @ w1.T + b1)
    ref = ref @ w2.T + b2
    assert v.shape == (batch, 1)
    assert jnp.allclose(v, ref, atol=1e-5), "kernel mismatch vs reference"

    print("KERNEL_OK")
</pallas_src>

<mosaic_0001>
module attributes {stable_mosaic.version = 11 : i64} {
  func.func @critic_kernel(%arg0: i32, %arg1: memref<16x128xf32, #tpu.memory_space<vmem>>, %arg2: memref<64x16xf32, #tpu.memory_space<vmem>>, %arg3: memref<64x1xf32, #tpu.memory_space<vmem>>, %arg4: memref<64x64xf32, #tpu.memory_space<vmem>>, %arg5: memref<64x1xf32, #tpu.memory_space<vmem>>, %arg6: memref<64x1xf32, #tpu.memory_space<vmem>>, %arg7: memref<1x1xf32, #tpu.memory_space<vmem>>, %arg8: memref<1x128xf32, #tpu.memory_space<vmem>>) attributes {dimension_semantics = [#tpu.dimension_semantics<parallel>], iteration_bounds = array<i64: 1>, scalar_prefetch = 0 : i64, scratch_operands = 0 : i64, tpu.core_type = #tpu.core_type<tc>, window_params = [{transform_indices = @transform_0, window_bounds = array<i64: 16, 128>}, {pipeline_mode = #tpu.pipeline_mode<synchronous>, transform_indices = @transform_1, window_bounds = array<i64: 64, 16>}, {pipeline_mode = #tpu.pipeline_mode<synchronous>, transform_indices = @transform_2, window_bounds = array<i64: 64, 1>}, {pipeline_mode = #tpu.pipeline_mode<synchronous>, transform_indices = @transform_3, window_bounds = array<i64: 64, 64>}, {pipeline_mode = #tpu.pipeline_mode<synchronous>, transform_indices = @transform_4, window_bounds = array<i64: 64, 1>}, {pipeline_mode = #tpu.pipeline_mode<synchronous>, transform_indices = @transform_5, window_bounds = array<i64: 64, 1>}, {pipeline_mode = #tpu.pipeline_mode<synchronous>, transform_indices = @transform_6, window_bounds = array<i64: 1, 1>}, {transform_indices = @transform_7, window_bounds = array<i64: 1, 128>}]} {
    %c0 = arith.constant 0 : index
    %c0_0 = arith.constant 0 : index
    %0 = vector.load %arg1[%c0, %c0_0] : memref<16x128xf32, #tpu.memory_space<vmem>>, vector<16x128xf32>
    %c0_1 = arith.constant 0 : index
    %c0_2 = arith.constant 0 : index
    %1 = vector.load %arg2[%c0_1, %c0_2] : memref<64x16xf32, #tpu.memory_space<vmem>>, vector<64x16xf32>
    %cst = arith.constant dense<0.000000e+00> : vector<64x128xf32>
    %2 = tpu.matmul %1, %0, %cst {dimension_numbers = #tpu.dot_dimension_numbers<[1], [0], [0], [1], [0, 0, 1, 1], [], []>} : vector<64x16xf32>, vector<16x128xf32>, vector<64x128xf32> -> vector<64x128xf32>
    %c0_3 = arith.constant 0 : index
    %c0_4 = arith.constant 0 : index
    %3 = vector.load %arg3[%c0_3, %c0_4] : memref<64x1xf32, #tpu.memory_space<vmem>>, vector<64x1xf32>
    %4 = vector.broadcast %3 : vector<64x1xf32> to vector<64x128xf32>
    %5 = arith.addf %2, %4 : vector<64x128xf32>
    %6 = math.tanh %5 : vector<64x128xf32>
    %c0_5 = arith.constant 0 : index
    %c0_6 = arith.constant 0 : index
    %7 = vector.load %arg4[%c0_5, %c0_6] : memref<64x64xf32, #tpu.memory_space<vmem>>, vector<64x64xf32>
    %cst_7 = arith.constant dense<0.000000e+00> : vector<64x128xf32>
    %8 = tpu.matmul %7, %6, %cst_7 {dimension_numbers = #tpu.dot_dimension_numbers<[1], [0], [0], [1], [0, 0, 1, 1], [], []>} : vector<64x64xf32>, vector<64x128xf32>, vector<64x128xf32> -> vector<64x128xf32>
    %c0_8 = arith.constant 0 : index
    %c0_9 = arith.constant 0 : index
    %9 = vector.load %arg5[%c0_8, %c0_9] : memref<64x1xf32, #tpu.memory_space<vmem>>, vector<64x1xf32>
    %10 = vector.broadcast %9 : vector<64x1xf32> to vector<64x128xf32>
    %11 = arith.addf %8, %10 : vector<64x128xf32>
    %12 = math.tanh %11 : vector<64x128xf32>
    %c0_10 = arith.constant 0 : index
    %c0_11 = arith.constant 0 : index
    %13 = vector.load %arg6[%c0_10, %c0_11] : memref<64x1xf32, #tpu.memory_space<vmem>>, vector<64x1xf32>
    %14 = vector.broadcast %13 : vector<64x1xf32> to vector<64x128xf32>
    %15 = arith.mulf %12, %14 : vector<64x128xf32>
    %cst_12 = arith.constant dense<0.000000e+00> : vector<128xf32>
    %16 = vector.multi_reduction <add>, %15, %cst_12 [0] : vector<64x128xf32> to vector<128xf32>
    %17 = vector.shape_cast %16 : vector<128xf32> to vector<1x128xf32>
    %c0_13 = arith.constant 0 : index
    %c0_14 = arith.constant 0 : index
    %18 = vector.load %arg7[%c0_13, %c0_14] : memref<1x1xf32, #tpu.memory_space<vmem>>, vector<1x1xf32>
    %19 = vector.broadcast %18 : vector<1x1xf32> to vector<1x128xf32>
    %20 = arith.addf %17, %19 : vector<1x128xf32>
    %c0_15 = arith.constant 0 : index
    %c0_16 = arith.constant 0 : index
    %21 = vector.load %arg8[%c0_15, %c0_16] : memref<1x128xf32, #tpu.memory_space<vmem>>, vector<1x128xf32>
    tpu.vector_store %arg8[%c0_15, %c0_16], %20 {strides = array<i32>} : memref<1x128xf32, #tpu.memory_space<vmem>>, vector<1x128xf32>,
    return
  }
  func.func @transform_0(%arg0: i32) -> (i32, i32) {
    %c0_i32 = arith.constant 0 : i32
    %c0_i32_0 = arith.constant 0 : i32
    return %c0_i32, %arg0 : i32, i32
  }
  func.func @transform_1(%arg0: i32) -> (i32, i32) {
    %c0_i32 = arith.constant 0 : i32
    %c0_i32_0 = arith.constant 0 : i32
    %c0_i32_1 = arith.constant 0 : i32
    return %c0_i32, %c0_i32_0 : i32, i32
  }
  func.func @transform_2(%arg0: i32) -> (i32, i32) {
    %c0_i32 = arith.constant 0 : i32
    %c0_i32_0 = arith.constant 0 : i32
    %c0_i32_1 = arith.constant 0 : i32
    return %c0_i32, %c0_i32_0 : i32, i32
  }
  func.func @transform_3(%arg0: i32) -> (i32, i32) {
    %c0_i32 = arith.constant 0 : i32
    %c0_i32_0 = arith.constant 0 : i32
    %c0_i32_1 = arith.constant 0 : i32
    return %c0_i32, %c0_i32_0 : i32, i32
  }
  func.func @transform_4(%arg0: i32) -> (i32, i32) {
    %c0_i32 = arith.constant 0 : i32
    %c0_i32_0 = arith.constant 0 : i32
    %c0_i32_1 = arith.constant 0 : i32
    return %c0_i32, %c0_i32_0 : i32, i32
  }
  func.func @transform_5(%arg0: i32) -> (i32, i32) {
    %c0_i32 = arith.constant 0 : i32
    %c0_i32_0 = arith.constant 0 : i32
    %c0_i32_1 = arith.constant 0 : i32
    return %c0_i32, %c0_i32_0 : i32, i32
  }
  func.func @transform_6(%arg0: i32) -> (i32, i32) {
    %c0_i32 = arith.constant 0 : i32
    %c0_i32_0 = arith.constant 0 : i32
    %c0_i32_1 = arith.constant 0 : i32
    return %c0_i32, %c0_i32_0 : i32, i32
  }
  func.func @transform_7(%arg0: i32) -> (i32, i32) {
    %c0_i32 = arith.constant 0 : i32
    %c0_i32_0 = arith.constant 0 : i32
    return %c0_i32, %arg0 : i32, i32
  }
}

</mosaic_0001>

<bundles_post_ra>
// kernel: critic_forward.1
= control target key start
LH: loop header
LB: loop body
LE: loop exit
PB: predicated region body
PF: predicated region fallthrough
CT: control target
= control target key end

     0   :  { %vm86_vm0 = vcmask 130048   ;;  %v640_v3 = vmov 0   ;;  %vm280_vm1 = vcmask 523264   ;;  %s829_s0 = inlined_call_operand.vmem [shape: f32[16,128], index: 0, kind: input, shape index: {}]   ;;  %s830_s1 = inlined_call_operand.vmem [shape: f32[64,16], index: 1, kind: input, shape index: {}]   ;;  %s831_s6 = inlined_call_operand.<no memory space> [shape: f32[1,1], index: 6, kind: input, shape index: {}]   ;;  %s832_s2 = inlined_call_operand.vmem [shape: f32[64,1], index: 2, kind: input, shape index: {}]   ;;  %s833_s4 = inlined_call_operand.vmem [shape: f32[64,1], index: 4, kind: input, shape index: {}]   ;;  %s834_s5 = inlined_call_operand.vmem [shape: f32[64,1], index: 5, kind: input, shape index: {}]   ;;  %s835_s3 = inlined_call_operand.vmem [shape: f32[64,64], index: 3, kind: input, shape index: {}]   ;;  %s836_s7 = inlined_call_operand.vmem [shape: f32[1,128], index: 7, kind: output, shape index: {}]  }
   0x1   :  { %v29_v0 = vld [vmem:[%s829_s0 + $0x8] sm:$0xff]  ;;  %v28_v1 = vld [vmem:[%s829_s0] sm:$0xff]  ;;  %606 = vset.pattern.permute.xlu0 %v640_v3  ;;  %607 = vset.pattern.permute.xlu1 %v640_v3  ;;  %v12_v4 = vstv %s831_s6  ;;  %v32_v6 = vld [vmem:[%s830_s1 + $0x10] sm:$0xff] }
   0x2   :  { %v30_v2 = vld [vmem:[%s830_s1] sm:$0xff]  ;;  %545 = vmatprep.subr.mxu0 %v29_v0  ;;  %13 = vst [vmem:[#allocation2] sm:$0x1] %v12_v4  ;;  %v31_v5 = vld [vmem:[%s830_s1 + $0x8] sm:$0xff]  ;;  %v45_v7 = vld [vmem:[%s832_s2 + $0x38] sm:$0xff] }
   0x3   :  { %549 = vmatprep.mubr.msk.f32.mxu0 %vm86_vm0, %v30_v2  ;;  %546 = vmatpush3.msra.mxu0 %v29_v0  ;;  %v43_v8 = vld [vmem:[%s832_s2 + $0x28] sm:$0xff]  ;;  %v44_v9 = vld [vmem:[%s832_s2 + $0x30] sm:$0xff]  ;;  %v33_v10 = vld [vmem:[%s830_s1 + $0x18] sm:$0xff] }
   0x4   :  { %547 = vmatprep.subr.mxu0 %v28_v1  ;;  %83 = vperm.xlu0 %606, %v45_v7   ;;  %v42_v11 = vld [vmem:[%s832_s2 + $0x20] sm:$0xff]  ;;  %v41_v13 = vld [vmem:[%s832_s2 + $0x18] sm:$0xff]  ;;  %v35_v14 = vld [vmem:[%s830_s1 + $0x28] sm:$0xff] }
   0x5   :  { %548 = vmatpush3.msra.mxu0 %v28_v1  ;;  %73 = vperm.xlu1 %607, %v43_v8   ;;  %v34_v12 = vld [vmem:[%s830_s1 + $0x20] sm:$0xff]  ;;  %v40_v15 = vld [vmem:[%s832_s2 + $0x10] sm:$0xff]  ;;  %v39_v17 = vld [vmem:[%s832_s2 + $0x8] sm:$0xff] }
   0x6   :  { %550 = vmatmul.mubr.msk.f32.vlgmr.msra.gmra.mxu0 %vm86_vm0, %v31_v5  ;;  %v36_v16 = vld [vmem:[%s830_s1 + $0x30] sm:$0xff]  ;;  %v37_v18 = vld [vmem:[%s830_s1 + $0x38] sm:$0xff]  ;;  %v38_v19 = vld [vmem:[%s832_s2] sm:$0xff] }
   0x7   :  { %552 = vmatprep.mubr.msk.f32.mxu0 %vm86_vm0, %v32_v6  ;;  %v232_v20 = vld [vmem:[%s833_s4] sm:$0xff]  ;;  %v233_v21 = vld [vmem:[%s833_s4 + $0x8] sm:$0xff]  ;;  %v234_v22 = vld [vmem:[%s833_s4 + $0x10] sm:$0xff] }
   0x8   :  { %78 = vperm.xlu0 %606, %v44_v9   ;;  %v235_v23 = vld [vmem:[%s833_s4 + $0x18] sm:$0xff]  ;;  %v236_v24 = vld [vmem:[%s833_s4 + $0x20] sm:$0xff]  ;;  %v237_v25 = vld [vmem:[%s833_s4 + $0x28] sm:$0xff] }
   0x9   :  { %68 = vperm.xlu1 %607, %v42_v11   ;;  %v238_v26 = vld [vmem:[%s833_s4 + $0x30] sm:$0xff]  ;;  %v239_v27 = vld [vmem:[%s833_s4 + $0x38] sm:$0xff]  ;;  %v418_v28 = vld [vmem:[%s834_s5] sm:$0xff] }
   0xa   :  { %553 = vmatmul.mubr.msk.f32.gmra.mxu0 %vm86_vm0, %v33_v10  ;;  %v419_v29 = vld [vmem:[%s834_s5 + $0x8] sm:$0xff]  ;;  %v420_v30 = vld [vmem:[%s834_s5 + $0x10] sm:$0xff]  ;;  %v421_v31 = vld [vmem:[%s834_s5 + $0x18] sm:$0xff] }
   0xb   :  { %555 = vmatprep.mubr.msk.f32.mxu0 %vm86_vm0, %v34_v12  ;;  %v422_v32 = vld [vmem:[%s834_s5 + $0x20] sm:$0xff]  ;;  %v423_v33 = vld [vmem:[%s834_s5 + $0x28] sm:$0xff]  ;;  %v424_v34 = vld [vmem:[%s834_s5 + $0x30] sm:$0xff] }
   0xc   :  { %63 = vperm.xlu0 %606, %v41_v13   ;;  %v425_v35 = vld [vmem:[%s834_s5 + $0x38] sm:$0xff]  ;;  %v487_v36 = vld [vmem:[#allocation2] sm:$0x1]  ;;  %v226_v38 = vld [vmem:[%s835_s3 + $0x10] sm:$0xff] }
   0xd   :  { %58 = vperm.xlu1 %607, %v40_v15   ;;  %v224_v37 = vld [vmem:[%s835_s3] sm:$0xff]  ;;  %580 = vmatprep.mubr.msk.f32.mxu1 %vm280_vm1, %v226_v38  ;;  %v225_v7 = vld [vmem:[%s835_s3 + $0x8] sm:$0xff]  ;;  %v227_v8 = vld [vmem:[%s835_s3 + $0x18] sm:$0xff] }
   0xe   :  { %556 = vmatmul.mubr.msk.f32.gmra.mxu0 %vm86_vm0, %v35_v14  ;;  %v228_v9 = vld [vmem:[%s835_s3 + $0x20] sm:$0xff]  ;;  %v229_v10 = vld [vmem:[%s835_s3 + $0x28] sm:$0xff]  ;;  %v230_v11 = vld [vmem:[%s835_s3 + $0x30] sm:$0xff] }
   0xf   :  { %558 = vmatprep.mubr.msk.f32.mxu0 %vm86_vm0, %v36_v16  ;;  %v231_v12 = vld [vmem:[%s835_s3 + $0x38] sm:$0xff] }
  0x10   :  { %53 = vperm.xlu0 %606, %v39_v17  }
  0x11   :  { %48 = vperm.xlu1 %607, %v38_v19  }
  0x12   :  { %559 = vmatmul.mubr.msk.f32.gmra.mxu0 %vm86_vm0, %v37_v18 }
  0x13   :  { %577 = vmatprep.mubr.msk.f32.mxu0 %vm280_vm1, %v224_v37 }
  0x14   :  { %242 = vperm.xlu0 %606, %v232_v20  }
  0x15   :  { %247 = vperm.xlu1 %607, %v233_v21  }
  0x18   :  { %252 = vperm.xlu0 %606, %v234_v22  }
  0x19   :  { %257 = vperm.xlu1 %607, %v235_v23  }
  0x1c   :  { %262 = vperm.xlu0 %606, %v236_v24  }
  0x1d   :  { %267 = vperm.xlu1 %607, %v237_v25  }
  0x20   :  { %272 = vperm.xlu0 %606, %v238_v26  }
  0x21   :  { %277 = vperm.xlu1 %607, %v239_v27  }
  0x24   :  { %428 = vperm.xlu0 %606, %v418_v28  }
  0x25   :  { %433 = vperm.xlu1 %607, %v419_v29  }
  0x28   :  { %438 = vperm.xlu0 %606, %v420_v30  }
  0x29   :  { %443 = vperm.xlu1 %607, %v421_v31  }
  0x2c   :  { %448 = vperm.xlu0 %606, %v422_v32  }
  0x2d   :  { %453 = vperm.xlu1 %607, %v423_v33  }
  0x30   :  { %458 = vperm.xlu0 %606, %v424_v34  }
  0x31   :  { %463 = vperm.xlu1 %607, %v425_v35  }
  0x34   :  { %490 = vperm.xlu0 %606, %v487_v36  }
  0x7f   :  { %v84_v41 = vpop.permute.xlu0 %83 }
  0x80   :  { %v74_v43 = vpop.permute.xlu1 %73 }
  0x83   :  { %v79_v46 = vpop.permute.xlu0 %78 }
  0x84   :  { %v69_v48 = vpop.permute.xlu1 %68 }
  0x87   :  { %v64_v54 = vpop.permute.xlu0 %63 }
  0x88   :  { %v59_v56 = vpop.permute.xlu1 %58 }
  0x8b   :  { %v54_v59 = vpop.permute.xlu0 %53 }
  0x8c   :  { %v49_v61 = vpop.permute.xlu1 %48 }
  0x8f   :  { %v243_v13 = vpop.permute.xlu0 %242 }
  0x90   :  { %v248_v14 = vpop.permute.xlu1 %247 }
  0x93   :  { %v253_v15 = vpop.permute.xlu0 %252 }
  0x94   :  { %v258_v16 = vpop.permute.xlu1 %257 }
  0x97   :  { %v263_v17 = vpop.permute.xlu0 %262 }
  0x98   :  { %v268_v18 = vpop.permute.xlu1 %267 }
  0x9b   :  { %v273_v27 = vpop.permute.xlu0 %272 }
  0x9c   :  { %v278_v29 = vpop.permute.xlu1 %277 }
  0x9f   :  { %v429_v34 = vpop.permute.xlu0 %428 }
  0xa0   :  { %v434_v38 = vpop.permute.xlu1 %433 }
  0xc6   :  { %v551_v39 = vpop.f32.mrf.mxu0 }
  0xc7   :  { %v183_v60 = vadd.f32 %v551_v39, %v54_v59 }
  0xc8   :  { %v177_v40 = vpop.f32.mrf.mxu0 }
  0xc9   :  { %v178_v62 = vadd.f32 %v177_v40, %v49_v61  ;;  %v439_v40 = vpop.permute.xlu0 %438 }
  0xca   :  { %v554_v42 = vpop.f32.mrf.mxu0 }
  0xcb   :  { %v193_v57 = vadd.f32 %v554_v42, %v64_v54  ;;  %v444_v42 = vpop.permute.xlu1 %443 }
  0xcc   :  { %v187_v44 = vpop.f32.mrf.mxu0 }
  0xcd   :  { %v188_v58 = vadd.f32 %v187_v44, %v59_v56 }
  0xce   :  { %v557_v45 = vpop.f32.mrf.mxu0 }
  0xcf   :  { %v203_v52 = vadd.f32 %v557_v45, %v74_v43  ;;  %v454_v54 = vpop.permute.xlu1 %453 }
  0xd0   :  { %v197_v47 = vpop.f32.mrf.mxu0 }
  0xd1   :  { %v198_v55 = vadd.f32 %v197_v47, %v69_v48 }
  0xd2   :  { %v560_v49 = vpop.f32.mrf.mxu0 }
  0xd3   :  { %v213_v50 = vadd.f32 %v560_v49, %v84_v41 }
  0xd4   :  { %v207_v51 = vpop.f32.mrf.mxu0 }
  0xd5   :  { %608 = vtanh.f32 %v213_v50  ;;  %v208_v53 = vadd.f32 %v207_v51, %v79_v46  ;;  %v449_v50 = vpop.permute.xlu0 %448 }
  0xd7   :  { %610 = vtanh.f32 %v208_v53 }
  0xd8   :  { %612 = vtanh.f32 %v203_v52 }
  0xd9   :  { %614 = vtanh.f32 %v198_v55  ;;  %v459_v61 = vpop.permute.xlu0 %458 }
  0xda   :  { %616 = vtanh.f32 %v193_v57 }
  0xdb   :  { %618 = vtanh.f32 %v188_v58 }
  0xdc   :  { %620 = vtanh.f32 %v183_v60 }
  0xdd   :  { %622 = vtanh.f32 %v178_v62 }
  0xe2   :  { %v609_v63 = vpop.eup %608 }
  0xe3   :  { %561 = vmatprep.subr.mxu0 %v609_v63  ;;  %589 = vmatprep.subr.mxu1 %v609_v63 }
  0xe4   :  { %v611_v0 = vpop.eup %610  ;;  %562 = vmatpush3.msra.mxu0 %v609_v63  ;;  %597 = vmatpush3.msra.mxu1 %v609_v63 }
  0xe5   :  { %563 = vmatprep.subr.mxu0 %v611_v0  ;;  %590 = vmatprep.subr.mxu1 %v611_v0  ;;  %v613_v1 = vpop.eup %612 }
  0xe6   :  { %564 = vmatpush3.msra.mxu0 %v611_v0  ;;  %598 = vmatpush3.msra.mxu1 %v611_v0  ;;  %v615_v2 = vpop.eup %614  ;;  %v464_v0 = vpop.permute.xlu1 %463 }
  0xe7   :  { %565 = vmatprep.subr.mxu0 %v613_v1  ;;  %591 = vmatprep.subr.mxu1 %v613_v1  ;;  %v617_v3 = vpop.eup %616 }
  0xe8   :  { %566 = vmatpush3.msra.mxu0 %v613_v1  ;;  %599 = vmatpush3.msra.mxu1 %v613_v1  ;;  %v619_v4 = vpop.eup %618 }
  0xe9   :  { %567 = vmatprep.subr.mxu0 %v615_v2  ;;  %592 = vmatprep.subr.mxu1 %v615_v2  ;;  %v621_v5 = vpop.eup %620 }
  0xea   :  { %568 = vmatpush3.msra.mxu0 %v615_v2  ;;  %600 = vmatpush3.msra.mxu1 %v615_v2  ;;  %v623_v6 = vpop.eup %622 }
  0xeb   :  { %569 = vmatprep.subr.mxu0 %v617_v3  ;;  %593 = vmatprep.subr.mxu1 %v617_v3 }
  0xec   :  { %570 = vmatpush3.msra.mxu0 %v617_v3  ;;  %601 = vmatpush3.msra.mxu1 %v617_v3  ;;  %v493_v3 = vlaneseq }
  0xed   :  { %571 = vmatprep.subr.mxu0 %v619_v4  ;;  %594 = vmatprep.subr.mxu1 %v619_v4 }
  0xee   :  { %572 = vmatpush3.msra.mxu0 %v619_v4  ;;  %602 = vmatpush3.msra.mxu1 %v619_v4 }
  0xef   :  { %573 = vmatprep.subr.mxu0 %v621_v5  ;;  %595 = vmatprep.subr.mxu1 %v621_v5 }
  0xf0   :  { %574 = vmatpush3.msra.mxu0 %v621_v5  ;;  %603 = vmatpush3.msra.mxu1 %v621_v5 }
  0xf1   :  { %575 = vmatprep.subr.mxu0 %v623_v6  ;;  %596 = vmatprep.subr.mxu1 %v623_v6 }
  0xf2   :  { %576 = vmatpush3.msra.mxu0 %v623_v6  ;;  %604 = vmatpush3.msra.mxu1 %v623_v6  ;;  %v494_v6 = vshrl.u32 %v493_v3, 7 }
  0xf3   :  { %578 = vmatmul.mubr.msk.f32.vlgmr.msra.gmra.mxu0 %vm280_vm1, %v225_v7  ;;  %581 = vmatmul.mubr.msk.f32.vlgmr.msra.gmra.mxu1 %vm280_vm1, %v227_v8 }
  0xf4   :  { %583 = vmatprep.mubr.msk.f32.mxu1 %vm280_vm1, %v228_v9  ;;  %v495_v9 = vsub.s32 0, %v494_v6 }
  0xf7   :  { %584 = vmatmul.mubr.msk.f32.gmra.mxu1 %vm280_vm1, %v229_v10 }
  0xf8   :  { %586 = vmatprep.mubr.msk.f32.mxu1 %vm280_vm1, %v230_v11  ;;  %v491_v11 = vpop.permute.xlu0 %490 }
  0xfb   :  { %587 = vmatmul.mubr.msk.f32.gmra.mxu1 %vm280_vm1, %v231_v12 }
 0x1b3   :  { %v579_v19 = vpop.f32.mrf.mxu0  ;;  %v582_v20 = vpop.f32.mrf.mxu1 }
 0x1b4   :  { %v377_v21 = vadd.f32 %v579_v19, %v248_v14  ;;  %v387_v24 = vadd.f32 %v582_v20, %v258_v16 }
 0x1b5   :  { %v371_v22 = vpop.f32.mrf.mxu0  ;;  %v381_v23 = vpop.f32.mrf.mxu1 }
 0x1b6   :  { %624 = vtanh.f32 %v377_v21  ;;  %v372_v25 = vadd.f32 %v371_v22, %v243_v13  ;;  %v382_v26 = vadd.f32 %v381_v23, %v253_v15  ;;  %v496_v13 = vrot.slane %v491_v11, %v495_v9 }
 0x1b7   :  { %v585_v28 = vpop.f32.mrf.mxu1 }
 0x1b8   :  { %626 = vtanh.f32 %v372_v25  ;;  %v397_v31 = vadd.f32 %v585_v28, %v268_v18 }
 0x1b9   :  { %628 = vtanh.f32 %v382_v26  ;;  %v391_v30 = vpop.f32.mrf.mxu1 }
 0x1ba   :  { %630 = vtanh.f32 %v387_v24  ;;  %v392_v32 = vadd.f32 %v391_v30, %v263_v17 }
 0x1bb   :  { %v588_v33 = vpop.f32.mrf.mxu1 }
 0x1bc   :  { %632 = vtanh.f32 %v392_v32  ;;  %v407_v36 = vadd.f32 %v588_v33, %v278_v29 }
 0x1bd   :  { %v401_v35 = vpop.f32.mrf.mxu1  ;;  %634 = vtanh.f32 %v397_v31 }
 0x1be   :  { %v402_v37 = vadd.f32 %v401_v35, %v273_v27 }
 0x1c0   :  { %636 = vtanh.f32 %v402_v37 }
 0x1c1   :  { %638 = vtanh.f32 %v407_v36 }
 0x1c3   :  { %v625_v39 = vpop.eup %624 }
 0x1c4   :  { %v467_v44 = vmul.f32 %v625_v39, %v434_v38 }
 0x1c5   :  { %v627_v41 = vpop.eup %626 }
 0x1c6   :  { %v629_v43 = vpop.eup %628  ;;  %v466_v45 = vmul.f32 %v627_v41, %v429_v34 }
 0x1c7   :  { %v631_v46 = vpop.eup %630  ;;  %v468_v48 = vmul.f32 %v629_v43, %v439_v40 }
 0x1c8   :  { %v474_v47 = vadd.f32 %v467_v44, %v466_v45  ;;  %v469_v51 = vmul.f32 %v631_v46, %v444_v42 }
 0x1c9   :  { %v633_v49 = vpop.eup %632 }
 0x1ca   :  { %v475_v52 = vadd.f32 %v474_v47, %v468_v48  ;;  %v635_v53 = vpop.eup %634  ;;  %v470_v55 = vmul.f32 %v633_v49, %v449_v50 }
 0x1cb   :  { %v471_v58 = vmul.f32 %v635_v53, %v454_v54 }
 0x1cc   :  { %v476_v56 = vadd.f32 %v475_v52, %v469_v51 }
 0x1cd   :  { %v637_v57 = vpop.eup %636 }
 0x1ce   :  { %v477_v59 = vadd.f32 %v476_v56, %v470_v55  ;;  %v639_v60 = vpop.eup %638  ;;  %v472_v62 = vmul.f32 %v637_v57, %v459_v61 }
 0x1cf   :  { %v473_v1 = vmul.f32 %v639_v60, %v464_v0 }
 0x1d0   :  { %v478_v63 = vadd.f32 %v477_v59, %v471_v58 }
 0x1d2   :  { %v479_v2 = vadd.f32 %v478_v63, %v472_v62 }
 0x1d4   :  { %v480_v4 = vadd.f32 %v479_v2, %v473_v1 }
 0x1d6   :  { %v481_v5 = vrot.slane %v480_v4, 4 }
 0x1d8   :  { %v482_v7 = vadd.f32 %v481_v5, %v480_v4 }
 0x1da   :  { %v483_v8 = vrot.slane %v482_v7, 2 }
 0x1dc   :  { %v484_v10 = vadd.f32 %v483_v8, %v482_v7 }
 0x1de   :  { %v485_v12 = vrot.slane %v484_v10, 1 }
 0x1e0   :  { %v486_v14 = vadd.f32 %v485_v12, %v484_v10 }
 0x1e2   :  { %v497_v15 = vadd.f32 %v496_v13, %v486_v14 }
 0x1e4   :  { %498 = vst [vmem:[%s836_s7] sm:$0x1] %v497_v15 }

</bundles_post_ra>
